<compile_context>
chip_gen: v7x
topology: tpu7x:2x2x1
jax: 0.10.0
libtpu: 0.0.40
codegen_flags: <defaults>
</compile_context>

<pallas_src>
import math
from functools import partial

import jax
import jax.numpy as jnp
from jax import lax
from jax.experimental import pallas as pl
from jax.experimental.pallas import tpu as pltpu


def basic_block_kernel(p_ref, w_ref, gb_ref, gm2_ref, o_ref, *, eps):
    """One batch-block per grid step, channel-major (lane-dense) layout.

    p_ref   : (nb, 9*Cin+1, H*W)  im2col patches + a row of ones (bias tap)
    w_ref   : (Cout, 9*Cin+1)     packed 3x3 conv weights + bias column
    gb_ref  : (Cout, 2)           GroupNorm gamma (col 0) / beta (col 1)
    gm2_ref : (2*Cout, 2*Cout)    block-diag same-group matrix, pre-scaled by 1/(HW*cpg)
    o_ref   : (nb, Cout, H*W)     output tile (already NCHW after wrapper reshape)
    """
    nb, Cout, HW = o_ref.shape

    w = w_ref[...]                                    # (Cout, KC+1)
    gb = gb_ref[...]                                  # (Cout, 2)
    gamma = gb[:, 0:1]
    beta = gb[:, 1:2]
    gm2 = gm2_ref[...]                                # (2*Cout, 2*Cout)
    inv_sqrt2 = jnp.float32(1.0 / math.sqrt(2.0))

    for i in range(nb):                               # static, fully unrolled (nb <= 2)
        # ---- 3x3 "same" conv (+bias) as one MXU matmul: K = 9*Cin+1, N = HW lanes
        acc = jnp.dot(w, p_ref[i], preferred_element_type=jnp.float32)    # (Cout, HW)

        # ---- GroupNorm per-sample stats: sublane-stack [acc; acc^2], one lane
        #      reduce (XLU), one block-diag matmul -> [mean; E[x^2]] per channel.
        stacked = jnp.concatenate([acc, acc * acc], axis=0)               # (2*Cout, HW)
        ssum = jnp.sum(stacked, axis=1, keepdims=True)                    # (2*Cout, 1)
        gstats = jnp.dot(gm2, ssum, preferred_element_type=jnp.float32)   # (2*Cout, 1)
        mean = gstats[0:Cout, :]                                          # (Cout, 1)
        ex2 = gstats[Cout:2 * Cout, :]                                    # (Cout, 1)
        var = jnp.maximum(ex2 - mean * mean, 0.0)      # clamp: avoid NaN from cancellation
        scale = lax.rsqrt(var + eps) * gamma           # fold gamma into scale
        shift = beta - mean * scale
        yn = acc * scale + shift                       # (Cout, HW)

        # ---- GELU, exact erf form (PyTorch nn.GELU default approximate='none')
        out = 0.5 * yn * (1.0 + lax.erf(yn * inv_sqrt2))

        # Dropout2d: identity in eval mode.
        # TODO(synk): training-mode Dropout2d (random whole-channel masking) not implemented.
        o_ref[i] = out.astype(o_ref.dtype)


def _num_grid_blocks(n):
    """v7x has 2 TensorCores/chip -> keep >=2 parallel grid steps there.
    v5e/v6e have 1 TC -> a single big step removes N-1 grid-step overheads."""
    kind = ""
    try:
        kind = jax.devices()[0].device_kind.lower()
    except Exception:
        pass
    if "v7" in kind or "tpu7" in kind:
        return min(n, 2)
    return 1


def basic_block_forward(x_nchw, w_oihw, bias, gamma, beta, *, groups=8, eps=1e-5,
                        num_blocks=None):
    N, Cin, H, W = x_nchw.shape
    Cout = w_oihw.shape[0]
    assert Cout % groups == 0
    cpg = Cout // groups
    KC = 9 * Cin
    HW = H * W

    if num_blocks is None:
        num_blocks = _num_grid_blocks(N)
    num_blocks = max(1, min(num_blocks, N))
    nb = -(-N // num_blocks)                 # images per grid step
    Npad = num_blocks * nb

    x = x_nchw.astype(jnp.float32)
    if Npad != N:
        x = jnp.pad(x, ((0, Npad - N), (0, 0), (0, 0), (0, 0)))

    # im2col in XLA (channel-major so no relayouts are needed inside the kernel),
    # plus a constant-1 row so the conv bias rides the same matmul.
    x_pad = jnp.pad(x, ((0, 0), (0, 0), (1, 1), (1, 1)))            # (Npad, Cin, H+2, W+2)
    taps = [x_pad[:, :, dy:dy + H, dx:dx + W]
            for dy in range(3) for dx in range(3)]                   # 9 x (Npad, Cin, H, W)
    patches = jnp.stack(taps, axis=1).reshape(Npad, KC, HW)          # (Npad, 9*Cin, HW)
    patches = jnp.concatenate(
        [patches, jnp.ones((Npad, 1, HW), jnp.float32)], axis=1)     # (Npad, KC+1, HW)

    # (Cout, Cin, 3, 3) -> (Cout, 9*Cin) tap-major, cin-minor; append bias column.
    w_t = jnp.transpose(w_oihw, (0, 2, 3, 1)).reshape(Cout, KC).astype(jnp.float32)
    w_aug = jnp.concatenate(
        [w_t, bias.reshape(Cout, 1).astype(jnp.float32)], axis=1)    # (Cout, KC+1)

    # gamma/beta packed into one operand.
    gb = jnp.stack([gamma.astype(jnp.float32), beta.astype(jnp.float32)], axis=1)  # (Cout, 2)

    # Block-diagonal same-group matrix with 1/(HW*cpg) pre-folded:
    # rows 0..Cout-1 produce per-channel group mean, rows Cout..2*Cout-1 produce E[x^2].
    gm = (jnp.arange(Cout)[:, None] // cpg
          == jnp.arange(Cout)[None, :] // cpg).astype(jnp.float32) * (1.0 / (HW * cpg))
    gm2 = jnp.zeros((2 * Cout, 2 * Cout), jnp.float32)
    gm2 = gm2.at[:Cout, :Cout].set(gm)
    gm2 = gm2.at[Cout:, Cout:].set(gm)

    kernel = partial(basic_block_kernel, eps=eps)

    flops = int(2 * Npad * Cout * (KC + 1) * HW + 2 * Npad * (2 * Cout) * (2 * Cout))
    bytes_accessed = int(4 * (patches.size + w_aug.size + gb.size + gm2.size
                              + Npad * Cout * HW))
    transcendentals = int(Npad * Cout * HW)          # erf (+ per-channel rsqrt, negligible)

    out = pl.pallas_call(
        kernel,
        out_shape=jax.ShapeDtypeStruct((Npad, Cout, HW), jnp.float32),
        grid=(num_blocks,),
        in_specs=[
            pl.BlockSpec((nb, KC + 1, HW), lambda b: (b, 0, 0)),
            pl.BlockSpec((Cout, KC + 1), lambda b: (0, 0)),
            pl.BlockSpec((Cout, 2), lambda b: (0, 0)),
            pl.BlockSpec((2 * Cout, 2 * Cout), lambda b: (0, 0)),
        ],
        out_specs=pl.BlockSpec((nb, Cout, HW), lambda b: (b, 0, 0)),
        compiler_params=pltpu.CompilerParams(dimension_semantics=("parallel",)),
        cost_estimate=pl.CostEstimate(flops=flops,
                                      transcendentals=transcendentals,
                                      bytes_accessed=bytes_accessed),
    )(patches, w_aug, gb, gm2)

    # (Npad, Cout, H*W) -> NCHW with a cheap reshape (no transpose needed).
    out = out.reshape(Npad, Cout, H, W)
    return out[:N] if Npad != N else out


def basic_block_ref(x_nchw, w_oihw, bias, gamma, beta, *, groups=8, eps=1e-5):
    """Pure-JAX reference mirroring the PyTorch forward (eval mode)."""
    y = lax.conv_general_dilated(
        x_nchw, w_oihw, window_strides=(1, 1), padding="SAME",
        dimension_numbers=("NCHW", "OIHW", "NCHW"))
    y = y + bias[None, :, None, None]
    N, C, H, W = y.shape
    yg = y.reshape(N, groups, -1)
    mean = yg.mean(axis=2, keepdims=True)
    var = yg.var(axis=2, keepdims=True)
    yn = ((yg - mean) * lax.rsqrt(var + eps)).reshape(N, C, H, W)
    yn = yn * gamma[None, :, None, None] + beta[None, :, None, None]
    return 0.5 * yn * (1.0 + lax.erf(yn / jnp.sqrt(2.0)))


if __name__ == "__main__":
    # Small shapes consistent with BasicBlock(in_channels=4, out_channels=16, groups=8)
    N, Cin, Cout, H, W, groups = 2, 4, 16, 16, 16, 8

    key = jax.random.PRNGKey(0)
    kx, kw, kb, kg, kbe = jax.random.split(key, 5)
    x = jax.random.normal(kx, (N, Cin, H, W), jnp.float32)
    w = jax.random.normal(kw, (Cout, Cin, 3, 3), jnp.float32) * 0.1
    b = jax.random.normal(kb, (Cout,), jnp.float32) * 0.1
    gamma = 1.0 + 0.1 * jax.random.normal(kg, (Cout,), jnp.float32)
    beta = 0.1 * jax.random.normal(kbe, (Cout,), jnp.float32)

    forward = jax.jit(partial(basic_block_forward, groups=groups))
    out = jax.block_until_ready(forward(x, w, b, gamma, beta))

    ref = jax.block_until_ready(basic_block_ref(x, w, b, gamma, beta, groups=groups))
    assert out.shape == (N, Cout, H, W)
    assert bool(jnp.allclose(out, ref, atol=2e-4, rtol=2e-4)), \
        f"max abs diff {float(jnp.max(jnp.abs(out - ref)))}"

    print("KERNEL_OK")
</pallas_src>

<mosaic_0001>
module attributes {stable_mosaic.version = 11 : i64} {
  func.func @basic_block_kernel(%arg0: i32, %arg1: memref<2x37x256xf32, #tpu.memory_space<vmem>>, %arg2: memref<16x37xf32, #tpu.memory_space<vmem>>, %arg3: memref<16x2xf32, #tpu.memory_space<vmem>>, %arg4: memref<32x32xf32, #tpu.memory_space<vmem>>, %arg5: memref<2x16x256xf32, #tpu.memory_space<vmem>>) attributes {dimension_semantics = [#tpu.dimension_semantics<parallel>], iteration_bounds = array<i64: 1>, scalar_prefetch = 0 : i64, scratch_operands = 0 : i64, tpu.core_type = #tpu.core_type<tc>, window_params = [{transform_indices = @transform_0, window_bounds = array<i64: 2, 37, 256>}, {pipeline_mode = #tpu.pipeline_mode<synchronous>, transform_indices = @transform_1, window_bounds = array<i64: 16, 37>}, {pipeline_mode = #tpu.pipeline_mode<synchronous>, transform_indices = @transform_2, window_bounds = array<i64: 16, 2>}, {pipeline_mode = #tpu.pipeline_mode<synchronous>, transform_indices = @transform_3, window_bounds = array<i64: 32, 32>}, {transform_indices = @transform_4, window_bounds = array<i64: 2, 16, 256>}]} {
    %c0 = arith.constant 0 : index
    %c0_0 = arith.constant 0 : index
    %0 = vector.load %arg2[%c0, %c0_0] : memref<16x37xf32, #tpu.memory_space<vmem>>, vector<16x37xf32>
    %c0_1 = arith.constant 0 : index
    %c0_2 = arith.constant 0 : index
    %1 = vector.load %arg3[%c0_1, %c0_2] : memref<16x2xf32, #tpu.memory_space<vmem>>, vector<16x2xf32>
    %2 = vector.extract_strided_slice %1 {offsets = [0, 0], sizes = [16, 1], strides = [1, 1]} : vector<16x2xf32> to vector<16x1xf32>
    %3 = vector.extract_strided_slice %1 {offsets = [0, 1], sizes = [16, 1], strides = [1, 1]} : vector<16x2xf32> to vector<16x1xf32>
    %c0_3 = arith.constant 0 : index
    %c0_4 = arith.constant 0 : index
    %4 = vector.load %arg4[%c0_3, %c0_4] : memref<32x32xf32, #tpu.memory_space<vmem>>, vector<32x32xf32>
    %c0_5 = arith.constant 0 : index
    %c0_6 = arith.constant 0 : index
    %c0_7 = arith.constant 0 : index
    %5 = vector.load %arg1[%c0_5, %c0_6, %c0_7] : memref<2x37x256xf32, #tpu.memory_space<vmem>>, vector<1x37x256xf32>
    %6 = vector.shape_cast %5 : vector<1x37x256xf32> to vector<37x256xf32>
    %cst = arith.constant dense<0.000000e+00> : vector<16x256xf32>
    %7 = tpu.matmul %0, %6, %cst {dimension_numbers = #tpu.dot_dimension_numbers<[1], [0], [0], [1], [0, 0, 1, 1], [], []>} : vector<16x37xf32>, vector<37x256xf32>, vector<16x256xf32> -> vector<16x256xf32>
    %8 = arith.mulf %7, %7 : vector<16x256xf32>
    %9 = tpu.concatenate %7, %8 in 0 : vector<16x256xf32>, vector<16x256xf32> -> vector<32x256xf32>
    %cst_8 = arith.constant dense<0.000000e+00> : vector<32xf32>
    %10 = vector.multi_reduction <add>, %9, %cst_8 [1] : vector<32x256xf32> to vector<32xf32>
    %11 = vector.shape_cast %10 : vector<32xf32> to vector<32x1xf32>
    %cst_9 = arith.constant dense<0.000000e+00> : vector<32x1xf32>
    %12 = tpu.matmul %4, %11, %cst_9 {dimension_numbers = #tpu.dot_dimension_numbers<[1], [0], [0], [1], [0, 0, 1, 1], [], []>} : vector<32x32xf32>, vector<32x1xf32>, vector<32x1xf32> -> vector<32x1xf32>
    %13 = vector.extract_strided_slice %12 {offsets = [0, 0], sizes = [16, 1], strides = [1, 1]} : vector<32x1xf32> to vector<16x1xf32>
    %14 = vector.extract_strided_slice %12 {offsets = [16, 0], sizes = [16, 1], strides = [1, 1]} : vector<32x1xf32> to vector<16x1xf32>
    %15 = arith.mulf %13, %13 : vector<16x1xf32>
    %16 = arith.subf %14, %15 : vector<16x1xf32>
    %cst_10 = arith.constant 0.000000e+00 : f32
    %17 = vector.broadcast %cst_10 : f32 to vector<16x1xf32>
    %18 = arith.maximumf %16, %17 : vector<16x1xf32>
    %cst_11 = arith.constant 9.99999974E-6 : f32
    %19 = vector.broadcast %cst_11 : f32 to vector<16x1xf32>
    %20 = arith.addf %18, %19 : vector<16x1xf32>
    %21 = math.rsqrt %20 : vector<16x1xf32>
    %22 = arith.mulf %21, %2 : vector<16x1xf32>
    %23 = arith.mulf %13, %22 : vector<16x1xf32>
    %24 = arith.subf %3, %23 : vector<16x1xf32>
    %25 = vector.broadcast %22 : vector<16x1xf32> to vector<16x256xf32>
    %26 = arith.mulf %7, %25 : vector<16x256xf32>
    %27 = vector.broadcast %24 : vector<16x1xf32> to vector<16x256xf32>
    %28 = arith.addf %26, %27 : vector<16x256xf32>
    %cst_12 = arith.constant 5.000000e-01 : f32
    %29 = vector.broadcast %cst_12 : f32 to vector<16x256xf32>
    %30 = arith.mulf %29, %28 : vector<16x256xf32>
    %cst_13 = arith.constant 0.707106769 : f32
    %31 = vector.broadcast %cst_13 : f32 to vector<16x256xf32>
    %32 = arith.mulf %28, %31 : vector<16x256xf32>
    %33 = math.erf %32 : vector<16x256xf32>
    %cst_14 = arith.constant 1.000000e+00 : f32
    %34 = vector.broadcast %cst_14 : f32 to vector<16x256xf32>
    %35 = arith.addf %34, %33 : vector<16x256xf32>
    %36 = arith.mulf %30, %35 : vector<16x256xf32>
    %c0_15 = arith.constant 0 : index
    %c0_16 = arith.constant 0 : index
    %c0_17 = arith.constant 0 : index
    %37 = vector.load %arg5[%c0_15, %c0_16, %c0_17] : memref<2x16x256xf32, #tpu.memory_space<vmem>>, vector<1x16x256xf32>
    %38 = vector.shape_cast %37 : vector<1x16x256xf32> to vector<16x256xf32>
    %39 = vector.shape_cast %36 : vector<16x256xf32> to vector<1x16x256xf32>
    tpu.vector_store %arg5[%c0_15, %c0_16, %c0_17], %39 {strides = array<i32>} : memref<2x16x256xf32, #tpu.memory_space<vmem>>, vector<1x16x256xf32>,
    %c1 = arith.constant 1 : index
    %c0_18 = arith.constant 0 : index
    %c0_19 = arith.constant 0 : index
    %40 = vector.load %arg1[%c1, %c0_18, %c0_19] : memref<2x37x256xf32, #tpu.memory_space<vmem>>, vector<1x37x256xf32>
    %41 = vector.shape_cast %40 : vector<1x37x256xf32> to vector<37x256xf32>
    %cst_20 = arith.constant dense<0.000000e+00> : vector<16x256xf32>
    %42 = tpu.matmul %0, %41, %cst_20 {dimension_numbers = #tpu.dot_dimension_numbers<[1], [0], [0], [1], [0, 0, 1, 1], [], []>} : vector<16x37xf32>, vector<37x256xf32>, vector<16x256xf32> -> vector<16x256xf32>
    %43 = arith.mulf %42, %42 : vector<16x256xf32>
    %44 = tpu.concatenate %42, %43 in 0 : vector<16x256xf32>, vector<16x256xf32> -> vector<32x256xf32>
    %cst_21 = arith.constant dense<0.000000e+00> : vector<32xf32>
    %45 = vector.multi_reduction <add>, %44, %cst_21 [1] : vector<32x256xf32> to vector<32xf32>
    %46 = vector.shape_cast %45 : vector<32xf32> to vector<32x1xf32>
    %cst_22 = arith.constant dense<0.000000e+00> : vector<32x1xf32>
    %47 = tpu.matmul %4, %46, %cst_22 {dimension_numbers = #tpu.dot_dimension_numbers<[1], [0], [0], [1], [0, 0, 1, 1], [], []>} : vector<32x32xf32>, vector<32x1xf32>, vector<32x1xf32> -> vector<32x1xf32>
    %48 = vector.extract_strided_slice %47 {offsets = [0, 0], sizes = [16, 1], strides = [1, 1]} : vector<32x1xf32> to vector<16x1xf32>
    %49 = vector.extract_strided_slice %47 {offsets = [16, 0], sizes = [16, 1], strides = [1, 1]} : vector<32x1xf32> to vector<16x1xf32>
    %50 = arith.mulf %48, %48 : vector<16x1xf32>
    %51 = arith.subf %49, %50 : vector<16x1xf32>
    %cst_23 = arith.constant 0.000000e+00 : f32
    %52 = vector.broadcast %cst_23 : f32 to vector<16x1xf32>
    %53 = arith.maximumf %51, %52 : vector<16x1xf32>
    %cst_24 = arith.constant 9.99999974E-6 : f32
    %54 = vector.broadcast %cst_24 : f32 to vector<16x1xf32>
    %55 = arith.addf %53, %54 : vector<16x1xf32>
    %56 = math.rsqrt %55 : vector<16x1xf32>
    %57 = arith.mulf %56, %2 : vector<16x1xf32>
    %58 = arith.mulf %48, %57 : vector<16x1xf32>
    %59 = arith.subf %3, %58 : vector<16x1xf32>
    %60 = vector.broadcast %57 : vector<16x1xf32> to vector<16x256xf32>
    %61 = arith.mulf %42, %60 : vector<16x256xf32>
    %62 = vector.broadcast %59 : vector<16x1xf32> to vector<16x256xf32>
    %63 = arith.addf %61, %62 : vector<16x256xf32>
    %cst_25 = arith.constant 5.000000e-01 : f32
    %64 = vector.broadcast %cst_25 : f32 to vector<16x256xf32>
    %65 = arith.mulf %64, %63 : vector<16x256xf32>
    %cst_26 = arith.constant 0.707106769 : f32
    %66 = vector.broadcast %cst_26 : f32 to vector<16x256xf32>
    %67 = arith.mulf %63, %66 : vector<16x256xf32>
    %68 = math.erf %67 : vector<16x256xf32>
    %cst_27 = arith.constant 1.000000e+00 : f32
    %69 = vector.broadcast %cst_27 : f32 to vector<16x256xf32>
    %70 = arith.addf %69, %68 : vector<16x256xf32>
    %71 = arith.mulf %65, %70 : vector<16x256xf32>
    %c1_28 = arith.constant 1 : index
    %c0_29 = arith.constant 0 : index
    %c0_30 = arith.constant 0 : index
    %72 = vector.load %arg5[%c1_28, %c0_29, %c0_30] : memref<2x16x256xf32, #tpu.memory_space<vmem>>, vector<1x16x256xf32>
    %73 = vector.shape_cast %72 : vector<1x16x256xf32> to vector<16x256xf32>
    %74 = vector.shape_cast %71 : vector<16x256xf32> to vector<1x16x256xf32>
    tpu.vector_store %arg5[%c1_28, %c0_29, %c0_30], %74 {strides = array<i32>} : memref<2x16x256xf32, #tpu.memory_space<vmem>>, vector<1x16x256xf32>,
    return
  }
  func.func @transform_0(%arg0: i32) -> (i32, i32, i32) {
    %c0_i32 = arith.constant 0 : i32
    %c0_i32_0 = arith.constant 0 : i32
    %c0_i32_1 = arith.constant 0 : i32
    return %arg0, %c0_i32, %c0_i32_0 : i32, i32, i32
  }
  func.func @transform_1(%arg0: i32) -> (i32, i32) {
    %c0_i32 = arith.constant 0 : i32
    %c0_i32_0 = arith.constant 0 : i32
    %c0_i32_1 = arith.constant 0 : i32
    return %c0_i32, %c0_i32_0 : i32, i32
  }
  func.func @transform_2(%arg0: i32) -> (i32, i32) {
    %c0_i32 = arith.constant 0 : i32
    %c0_i32_0 = arith.constant 0 : i32
    %c0_i32_1 = arith.constant 0 : i32
    return %c0_i32, %c0_i32_0 : i32, i32
  }
  func.func @transform_3(%arg0: i32) -> (i32, i32) {
    %c0_i32 = arith.constant 0 : i32
    %c0_i32_0 = arith.constant 0 : i32
    %c0_i32_1 = arith.constant 0 : i32
    return %c0_i32, %c0_i32_0 : i32, i32
  }
  func.func @transform_4(%arg0: i32) -> (i32, i32, i32) {
    %c0_i32 = arith.constant 0 : i32
    %c0_i32_0 = arith.constant 0 : i32
    %c0_i32_1 = arith.constant 0 : i32
    return %arg0, %c0_i32, %c0_i32_0 : i32, i32, i32
  }
}

</mosaic_0001>

<bundles_post_ra>
// kernel: basic_block_forward.1
= control target key start
LH: loop header
LB: loop body
LE: loop exit
PB: predicated region body
PF: predicated region fallthrough
CT: control target
= control target key end

     0   :  { %v730_v3 = vmov 0.0   ;;  %vm42_vm0 = vcmask 1044480   ;;  %vm35_vm1 = vcmask 302080   ;;  %vm142_vm2 = vcmask 261120   ;;  %s732_s15 = smov 1   ;;  %s955_s0 = inlined_call_operand.vmem [shape: f32[2,37,256], index: 0, kind: input, shape index: {}]   ;;  %s956_s1 = inlined_call_operand.vmem [shape: f32[16,37], index: 1, kind: input, shape index: {}]   ;;  %s957_s3 = inlined_call_operand.vmem [shape: f32[32,32], index: 3, kind: input, shape index: {}]   ;;  %s958_s2 = inlined_call_operand.vmem [shape: f32[16,2], index: 2, kind: input, shape index: {}]   ;;  %s959_s4 = inlined_call_operand.vmem [shape: f32[2,16,256], index: 4, kind: output, shape index: {}]  }
   0x1   :  { %v26_v0 = vld [vmem:[%s955_s0 + $0x8] sm:$0xff]  ;;  %v28_v1 = vld [vmem:[%s955_s0 + $0x18] sm:$0xff]  ;;  %v25_v2 = vld [vmem:[%s955_s0] sm:$0xff]  ;;  %113 = vmatprep.mubr.f32.mxu0 %v730_v3  ;;  %v731_v53 = vmov 0  }
   0x2   :  { %v666_v4 = vpack.c.bf16 %v28_v1, %v26_v0  ;;  %v27_v5 = vld [vmem:[%s955_s0 + $0x10] sm:$0xff]  ;;  %v30_v6 = vld [vmem:[%s955_s0 + $0x28] sm:$0xff]  ;;  %v32_v7 = vld [vmem:[%s955_s0 + $0x38] sm:$0xff]  ;;  %702 = vset.pattern.permute.xlu0 %v731_v53  ;;  %703 = vset.pattern.permute.xlu1 %v731_v53 }
   0x3   :  { %v668_v8 = vpack.c.bf16 %v27_v5, %v25_v2  ;;  %v670_v9 = vpack.c.bf16 %v32_v7, %v30_v6  ;;  %v29_v10 = vld [vmem:[%s955_s0 + $0x20] sm:$0xff]  ;;  %v31_v11 = vld [vmem:[%s955_s0 + $0x30] sm:$0xff]  ;;  %v34_v13 = vld [vmem:[%s955_s0 + $0x48] sm:$0x1f] }
   0x4   :  { %667 = vmatprep.subr.bf16.mxu0 %v666_v4  ;;  %v672_v12 = vpack.c.bf16 %v31_v11, %v29_v10  ;;  %v33_v14 = vld [vmem:[%s955_s0 + $0x40] sm:$0x1f]  ;;  %v18_v16 = vld [vmem:[%s956_s1 + $0x8] sm:$0xff]  ;;  %v601_v35 = vld [vmem:[%s955_s0 + $0x58] sm:$0xff] }
   0x5   :  { %669 = vmatpush1.bf16.msra.mxu0 %v668_v8  ;;  %v794_v15 = vld [vmem:[%s956_s1] sm:$0xff]  ;;  %v603_v36 = vld [vmem:[%s955_s0 + $0x68] sm:$0xff]  ;;  %v600_v39 = vld [vmem:[%s955_s0 + $0x50] sm:$0xff] }
   0x6   :  { %671 = vmatprep.subr.bf16.mxu0 %v670_v9  ;;  %v21_v29 = vld [vmem:[%s957_s3] sm:$0xff]  ;;  %v682_v38 = vpack.c.bf16 %v603_v36, %v601_v35  ;;  %v605_v41 = vld [vmem:[%s955_s0 + $0x78] sm:$0xff]  ;;  %v607_v42 = vld [vmem:[%s955_s0 + $0x88] sm:$0xff] }
   0x7   :  { %646 = vmatprep.mubr.msk.f32.mxu1 %vm142_vm2, %v21_v29  ;;  %v602_v40 = vld [vmem:[%s955_s0 + $0x60] sm:$0xff]  ;;  %v850_v43 = vld [vmem:[%s957_s3 + $0x8] sm:$0xff]  ;;  %v855_v45 = vld [vmem:[%s957_s3 + $0x10] sm:$0xff]  ;;  %v686_v46 = vpack.c.bf16 %v607_v42, %v605_v41 }
   0x8   :  { %v684_v44 = vpack.c.bf16 %v602_v40, %v600_v39  ;;  %v604_v47 = vld [vmem:[%s955_s0 + $0x70] sm:$0xff]  ;;  %v606_v48 = vld [vmem:[%s955_s0 + $0x80] sm:$0xff]  ;;  %v870_v49 = vld [vmem:[%s957_s3 + $0x18] sm:$0xff] }
   0x9   :  { %673 = vmatpush1.bf16.msra.mxu0 %v672_v12  ;;  %v688_v50 = vpack.c.bf16 %v606_v48, %v604_v47  ;;  %v609_v51 = vld [vmem:[%s955_s0 + $0x98] sm:$0x1f]  ;;  %v608_v52 = vld [vmem:[%s955_s0 + $0x90] sm:$0x1f] }
   0xa   :  { %592 = vmatprep.subr.msk.mxu0 %vm42_vm0, %v34_v13 }
   0xd   :  { %593 = vmatpush1.msk.msra.mxu0 %vm42_vm0, %v33_v14  ;;  %v19_v14 = vld [vmem:[%s958_s2] sm:$0xff] }
   0xe   :  { %594 = vmatmul.mubr.msk.f32.vlgmr.msra.gmra.mrb[0].mxu0 %vm35_vm1, %v794_v15 }
   0xf   :  { %119 = vmatprep.mubr.f32.mxu0 %v730_v3 }
  0x12   :  { %595 = vmatmul.mubr.msk.f32.gmra.mrb[2].mxu0 %vm35_vm1, %v18_v16 }
  0x13   :  { %660 = vmatprep.mubr.msk.f32.mxu0 %vm142_vm2, %v21_v29 }
  0xe1   :  { %v804_v17 = vpop.f32.mrb[0].mxu0 }
  0xe2   :  { %v806_v18 = vpop.f32.mrb[1].mxu0  ;;  %v126_v19 = vmul.f32 %v804_v17, %v804_v17 }
  0xe3   :  { %v130_v20 = vadd.f32 %v806_v18, %v804_v17  ;;  %v127_v21 = vmul.f32 %v806_v18, %v806_v18 }
  0xe5   :  { %131 = vadd.xlane.f32.xlu0 %v130_v20  ;;  %v814_v22 = vpop.f32.mrb[2].mxu0  ;;  %v136_v23 = vadd.f32 %v127_v21, %v126_v19  ;;  %v20_v21 = vld [vmem:[%s958_s2 + $0x8] sm:$0xff] }
  0xe6   :  { %v816_v24 = vpop.f32.mrb[3].mxu0  ;;  %v128_v25 = vmul.f32 %v814_v22, %v814_v22 }
  0xe7   :  { %137 = vadd.xlane.f32.xlu1 %v136_v23  ;;  %v133_v26 = vadd.f32 %v816_v24, %v814_v22  ;;  %v129_v27 = vmul.f32 %v816_v24, %v816_v24 }
  0xe9   :  { %134 = vadd.xlane.f32.xlu0 %v133_v26  ;;  %v139_v28 = vadd.f32 %v129_v27, %v128_v25 }
  0xeb   :  { %140 = vadd.xlane.f32.xlu1 %v139_v28 }
 0x172   :  { %v132_v30 = vpop.xlane.xlu0 %131 }
 0x174   :  { %v138_v31 = vpop.xlane.xlu1 %137 }
 0x176   :  { %v135_v32 = vpop.xlane.xlu0 %134 }
 0x177   :  { %v674_v33 = vpack.c.bf16 %v135_v32, %v132_v30 }
 0x178   :  { %v141_v34 = vpop.xlane.xlu1 %140 }
 0x179   :  { %v678_v37 = vpack.c.bf16 %v141_v34, %v138_v31  ;;  %675 = vmatprep.subr.bf16.mxu1 %v674_v33 }
 0x17a   :  { %677 = vmatpush3.bf16.msra.mxu1 %v674_v33 }
 0x17b   :  { %679 = vmatprep.subr.bf16.mxu1 %v678_v37 }
 0x17e   :  { %681 = vmatpush3.bf16.msra.mxu1 %v678_v37 }
 0x17f   :  { %683 = vmatprep.subr.bf16.mxu1 %v682_v38 }
 0x181   :  { %647 = vmatmul.mubr.msk.f32.vlgmr.msra.gmra.mrb[0].mxu1 %vm142_vm2, %v850_v43 }
 0x182   :  { %685 = vmatpush1.bf16.msra.mxu1 %v684_v44  ;;  %649 = vmatprep.mubr.msk.f32.mxu1 %vm142_vm2, %v855_v45 }
 0x183   :  { %687 = vmatprep.subr.bf16.mxu1 %v686_v46 }
 0x185   :  { %650 = vmatmul.mubr.msk.f32.gmra.mrb[2].mxu1 %vm142_vm2, %v870_v49 }
 0x186   :  { %689 = vmatpush1.bf16.msra.mxu1 %v688_v50  ;;  %397 = vmatprep.mubr.f32.mxu1 %v730_v3 }
 0x187   :  { %610 = vmatprep.subr.msk.mxu1 %vm42_vm0, %v609_v51 }
 0x18a   :  { %611 = vmatpush1.msk.msra.mxu1 %vm42_vm0, %v608_v52  ;;  %v733_v52 = vmov 1  }
 0x18b   :  { %612 = vmatmul.mubr.msk.f32.vlgmr.msra.gmra.mrb[4].mxu1 %vm35_vm1, %v794_v15 }
 0x18c   :  { %403 = vmatprep.mubr.f32.mxu1 %v730_v3 }
 0x18f   :  { %613 = vmatmul.mubr.msk.f32.gmra.mrb[6].mxu1 %vm35_vm1, %v18_v16 }
 0x254   :  { %v648_v54 = vpop.f32.mrb[0].mxu1 }
 0x255   :  { %v241_v55 = vmul.f32 %v648_v54, %v648_v54  ;;  %v221_v56 = vpop.f32.mrb[1].mxu1 }
 0x256   :  { %v240_v57 = vmul.f32 %v221_v56, %v221_v56 }
 0x258   :  { %v651_v58 = vpop.f32.mrb[2].mxu1 }
 0x259   :  { %v243_v59 = vsub.f32 %v651_v58, %v241_v55  ;;  %v231_v60 = vpop.f32.mrb[3].mxu1 }
 0x25a   :  { %v242_v61 = vsub.f32 %v231_v60, %v240_v57 }
 0x25b   :  { %v245_v3 = vmax.f32 %v243_v59, 0.0 }
 0x25c   :  { %v244_v62 = vmax.f32 %v242_v61, 0.0 }
 0x25d   :  { %v247_v10 = vadd.f32 1e-05, %v245_v3 }
 0x25e   :  { %v246_v63 = vadd.f32 1e-05, %v244_v62  ;;  %v887_v0 = vpop.f32.mrb[4].mxu1 }
 0x25f   :  { %v889_v1 = vpop.f32.mrb[5].mxu1  ;;  %v410_v2 = vmul.f32 %v887_v0, %v887_v0 }
 0x260   :  { %706 = vrsqrt.f32 %v246_v63  ;;  %v414_v4 = vadd.f32 %v889_v1, %v887_v0  ;;  %v411_v5 = vmul.f32 %v889_v1, %v889_v1 }
 0x261   :  { %708 = vrsqrt.f32 %v247_v10 }
 0x262   :  { %415 = vadd.xlane.f32.xlu0 %v414_v4  ;;  %v897_v6 = vpop.f32.mrb[6].mxu1  ;;  %v420_v7 = vadd.f32 %v411_v5, %v410_v2 }
 0x263   :  { %v899_v8 = vpop.f32.mrb[7].mxu1  ;;  %v412_v9 = vmul.f32 %v897_v6, %v897_v6 }
 0x264   :  { %v413_v11 = vmul.f32 %v899_v8, %v899_v8  ;;  %v417_v12 = vadd.f32 %v899_v8, %v897_v6 }
 0x266   :  { %421 = vadd.xlane.f32.xlu0 %v420_v7  ;;  %418 = vadd.xlane.f32.xlu1 %v417_v12  ;;  %v423_v13 = vadd.f32 %v413_v11, %v412_v9 }
 0x26a   :  { %v707_v15 = vpop.eup %706  ;;  %424 = vadd.xlane.f32.xlu1 %v423_v13 }
 0x26b   :  { %v250_v16 = vmul.f32 %v707_v15, %v19_v14  ;;  %v709_v20 = vpop.eup %708 }
 0x26c   :  { %v251_v23 = vmul.f32 %v709_v20, %v20_v21 }
 0x26d   :  { %v252_v19 = vmul.f32 %v250_v16, %v221_v56 }
 0x26e   :  { %v253_v25 = vmul.f32 %v648_v54, %v251_v23 }
 0x27b   :  { %258 = vrot.lane.b32.xlu1 %v253_v25, %s732_s15 }
 0x27c   :  { %256 = vrot.lane.b32.xlu0 %v252_v19, %s732_s15 }
 0x280   :  { %266 = vperm.xlu0 %702, %v250_v16  }
 0x2ef   :  { %v416_v26 = vpop.xlane.xlu0 %415 }
 0x2f3   :  { %v419_v27 = vpop.xlane.xlu1 %418  ;;  %v422_v29 = vpop.xlane.xlu0 %421 }
 0x2f4   :  { %v690_v28 = vpack.c.bf16 %v419_v27, %v416_v26 }
 0x2f6   :  { %691 = vmatprep.subr.bf16.mxu0 %v690_v28 }
 0x2f7   :  { %693 = vmatpush3.bf16.msra.mxu0 %v690_v28  ;;  %v425_v30 = vpop.xlane.xlu1 %424  ;;  %v257_v53 = vpop.permute.xlu0 %256 }
 0x2f8   :  { %v694_v31 = vpack.c.bf16 %v425_v30, %v422_v29  ;;  %v262_v54 = vsub.f32 %v19_v14, %v257_v53 }
 0x2fa   :  { %695 = vmatprep.subr.bf16.mxu0 %v694_v31 }
 0x2fb   :  { %697 = vmatpush3.bf16.msra.mxu0 %v694_v31  ;;  %v259_v48 = vpop.permute.xlu1 %258 }
 0x2fc   :  { %v263_v51 = vsub.f32 %v20_v21, %v259_v48 }
 0x2fe   :  { %661 = vmatmul.mubr.msk.f32.vlgmr.msra.gmra.mrb[4].mxu0 %vm142_vm2, %v850_v43 }
 0x2ff   :  { %663 = vmatprep.mubr.msk.f32.mxu0 %vm142_vm2, %v855_v45  ;;  %v267_v59 = vpop.permute.xlu0 %266 }
 0x302   :  { %664 = vmatmul.mubr.msk.f32.gmra.mrb[6].mxu0 %vm142_vm2, %v870_v49 }
 0x3d1   :  { %v662_v32 = vpop.f32.mrb[4].mxu0 }
 0x3d2   :  { %v492_v33 = vpop.f32.mrb[5].mxu0  ;;  %v512_v34 = vmul.f32 %v662_v32, %v662_v32 }
 0x3d3   :  { %v511_v35 = vmul.f32 %v492_v33, %v492_v33 }
 0x3d5   :  { %v665_v36 = vpop.f32.mrb[6].mxu0 }
 0x3d6   :  { %v514_v37 = vsub.f32 %v665_v36, %v512_v34  ;;  %v502_v38 = vpop.f32.mrb[7].mxu0 }
 0x3d7   :  { %v513_v39 = vsub.f32 %v502_v38, %v511_v35 }
 0x3d8   :  { %v516_v40 = vmax.f32 %v514_v37, 0.0 }
 0x3d9   :  { %v515_v41 = vmax.f32 %v513_v39, 0.0 }
 0x3da   :  { %v518_v42 = vadd.f32 1e-05, %v516_v40 }
 0x3db   :  { %v517_v44 = vadd.f32 1e-05, %v515_v41 }
 0x3dc   :  { %710 = vrsqrt.f32 %v518_v42 }
 0x3dd   :  { %712 = vrsqrt.f32 %v517_v44 }
 0x3e6   :  { %v711_v43 = vpop.eup %710 }
 0x3e7   :  { %v713_v46 = vpop.eup %712  ;;  %v522_v45 = vmul.f32 %v711_v43, %v20_v21 }
 0x3e8   :  { %v521_v47 = vmul.f32 %v713_v46, %v19_v14 }
 0x3e9   :  { %542 = vperm.xlu0 %702, %v522_v45   ;;  %v524_v49 = vmul.f32 %v662_v32, %v522_v45 }
 0x3ea   :  { %v523_v50 = vmul.f32 %v521_v47, %v492_v33 }
 0x3ec   :  { %527 = vrot.lane.b32.xlu1 %v523_v50, %s732_s15 }
 0x3ed   :  { %705 = vset.pattern.permute.xlu0 %v733_v52 }
 0x3ee   :  { %285 = vperm.xlu0 %705, %v263_v51  }
 0x3f0   :  { %529 = vrot.lane.b32.xlu1 %v524_v49, %s732_s15 }
 0x3f4   :  { %271 = vperm.xlu1 %703, %v251_v23  }
 0x3f8   :  { %537 = vperm.xlu1 %703, %v521_v47  }
 0x3fc   :  { %704 = vset.pattern.permute.xlu1 %v733_v52 }
 0x3fd   :  { %280 = vperm.xlu1 %704, %v262_v54  }
 0x45e   :  { %v528_v55 = vpop.permute.xlu1 %527 }
 0x45f   :  { %v533_v56 = vsub.f32 %v19_v14, %v528_v55 }
 0x461   :  { %551 = vperm.xlu1 %704, %v533_v56  }
 0x462   :  { %v530_v57 = vpop.permute.xlu1 %529 }
 0x463   :  { %v534_v58 = vsub.f32 %v20_v21, %v530_v57 }
 0x465   :  { %556 = vperm.xlu1 %704, %v534_v58  }
 0x468   :  { %v543_v60 = vpop.permute.xlu0 %542 }
 0x469   :  { %v547_v61 = vmul.f32 %v543_v60, %v897_v6  ;;  %v548_v62 = vmul.f32 %v543_v60, %v899_v8  ;;  %v274_v6 = vmul.f32 %v267_v59, %v804_v17  ;;  %v275_v8 = vmul.f32 %v267_v59, %v806_v18 }
 0x46d   :  { %v286_v4 = vpop.permute.xlu0 %285 }
 0x473   :  { %v272_v63 = vpop.permute.xlu1 %271 }
 0x474   :  { %v276_v2 = vmul.f32 %v272_v63, %v814_v22  ;;  %v277_v3 = vmul.f32 %v272_v63, %v816_v24 }
 0x476   :  { %v290_v5 = vadd.f32 %v286_v4, %v276_v2  ;;  %v291_v7 = vadd.f32 %v286_v4, %v277_v3 }
 0x477   :  { %v538_v9 = vpop.permute.xlu1 %537 }
 0x478   :  { %v298_v10 = vmul.f32 0.70710677, %v290_v5  ;;  %v299_v11 = vmul.f32 0.70710677, %v291_v7  ;;  %v545_v12 = vmul.f32 %v538_v9, %v887_v0  ;;  %v546_v13 = vmul.f32 %v538_v9, %v889_v1 }
 0x479   :  { %v294_v21 = vmul.f32 0.5, %v290_v5  ;;  %v295_v0 = vmul.f32 0.5, %v291_v7 }
 0x47a   :  { %714 = verf.f32 %v298_v10 }
 0x47b   :  { %716 = verf.f32 %v299_v11 }
 0x47c   :  { %v281_v14 = vpop.permute.xlu1 %280 }
 0x47d   :  { %v288_v22 = vadd.f32 %v281_v14, %v274_v6  ;;  %v289_v15 = vadd.f32 %v281_v14, %v275_v8 }
 0x47f   :  { %v296_v24 = vmul.f32 0.70710677, %v288_v22  ;;  %v297_v16 = vmul.f32 0.70710677, %v289_v15  ;;  %v292_v27 = vmul.f32 0.5, %v288_v22  ;;  %v293_v29 = vmul.f32 0.5, %v289_v15 }
 0x481   :  { %718 = verf.f32 %v296_v24 }
 0x482   :  { %720 = verf.f32 %v297_v16 }
 0x484   :  { %v715_v19 = vpop.eup %714 }
 0x485   :  { %v717_v20 = vpop.eup %716  ;;  %v306_v23 = vadd.f32 1.0, %v715_v19 }
 0x486   :  { %v307_v25 = vadd.f32 1.0, %v717_v20 }
 0x487   :  { %v310_v1 = vmul.f32 %v306_v23, %v294_v21 }
 0x488   :  { %v311_v26 = vmul.f32 %v307_v25, %v295_v0 }
 0x489   :  { %314 = vst [vmem:[%s959_s4 + $0x10] sm:$0xff] %v310_v1 }
 0x48a   :  { %315 = vst [vmem:[%s959_s4 + $0x18] sm:$0xff] %v311_v26 }
 0x48b   :  { %v719_v17 = vpop.eup %718 }
 0x48c   :  { %v721_v18 = vpop.eup %720  ;;  %v304_v28 = vadd.f32 1.0, %v719_v17 }
 0x48d   :  { %v305_v30 = vadd.f32 1.0, %v721_v18 }
 0x48e   :  { %v308_v31 = vmul.f32 %v304_v28, %v292_v27 }
 0x48f   :  { %v309_v32 = vmul.f32 %v305_v30, %v293_v29 }
 0x490   :  { %312 = vst [vmem:[%s959_s4] sm:$0xff] %v308_v31 }
 0x491   :  { %313 = vst [vmem:[%s959_s4 + $0x8] sm:$0xff] %v309_v32 }
 0x4e0   :  { %v552_v33 = vpop.permute.xlu1 %551 }
 0x4e1   :  { %v559_v34 = vadd.f32 %v552_v33, %v545_v12  ;;  %v560_v35 = vadd.f32 %v552_v33, %v546_v13 }
 0x4e3   :  { %v567_v36 = vmul.f32 0.70710677, %v559_v34  ;;  %v568_v37 = vmul.f32 0.70710677, %v560_v35  ;;  %v563_v46 = vmul.f32 0.5, %v559_v34  ;;  %v564_v47 = vmul.f32 0.5, %v560_v35 }
 0x4e4   :  { %v557_v38 = vpop.permute.xlu1 %556 }
 0x4e5   :  { %722 = verf.f32 %v567_v36  ;;  %v561_v39 = vadd.f32 %v557_v38, %v547_v61  ;;  %v562_v40 = vadd.f32 %v557_v38, %v548_v62 }
 0x4e6   :  { %724 = verf.f32 %v568_v37 }
 0x4e7   :  { %v569_v41 = vmul.f32 0.70710677, %v561_v39  ;;  %v570_v42 = vmul.f32 0.70710677, %v562_v40  ;;  %v565_v53 = vmul.f32 0.5, %v561_v39  ;;  %v566_v55 = vmul.f32 0.5, %v562_v40 }
 0x4e9   :  { %726 = verf.f32 %v569_v41 }
 0x4ea   :  { %728 = verf.f32 %v570_v42 }
 0x4ef   :  { %v723_v44 = vpop.eup %722 }
 0x4f0   :  { %v725_v43 = vpop.eup %724  ;;  %v575_v45 = vadd.f32 1.0, %v723_v44 }
 0x4f1   :  { %v576_v48 = vadd.f32 1.0, %v725_v43 }
 0x4f2   :  { %v579_v49 = vmul.f32 %v575_v45, %v563_v46 }
 0x4f3   :  { %v727_v50 = vpop.eup %726  ;;  %v580_v51 = vmul.f32 %v576_v48, %v564_v47 }
 0x4f4   :  { %v729_v52 = vpop.eup %728  ;;  %618 = vst [vmem:[%s959_s4 + $0x20] sm:$0xff] %v579_v49  ;;  %v577_v54 = vadd.f32 1.0, %v727_v50 }
 0x4f5   :  { %619 = vst [vmem:[%s959_s4 + $0x28] sm:$0xff] %v580_v51  ;;  %v578_v56 = vadd.f32 1.0, %v729_v52 }
 0x4f6   :  { %v581_v57 = vmul.f32 %v577_v54, %v565_v53 }
 0x4f7   :  { %v582_v58 = vmul.f32 %v578_v56, %v566_v55 }
 0x4f8   :  { %620 = vst [vmem:[%s959_s4 + $0x30] sm:$0xff] %v581_v57 }
 0x4f9   :  { %621 = vst [vmem:[%s959_s4 + $0x38] sm:$0xff] %v582_v58 }

</bundles_post_ra>
